<compile_context>
chip_gen: v5e
topology: v5e:2x2
jax: 0.10.0
libtpu: 0.0.40
codegen_flags: <defaults>
</compile_context>

<pallas_src>
import functools

import jax
import jax.numpy as jnp
from jax.experimental import pallas as pl
from jax.experimental.pallas import tpu as pltpu

BN_EPS = 1e-4
LEAKY_SLOPE = 0.01
LANE = 128


def _round_up(n, m):
    return (n + m - 1) // m * m


def _linear_bn_lrelu(x, w):
    """Linear(no bias) -> BatchNorm1d(train-mode, affine=False) -> LeakyReLU.

    x: [B, in] f32 activations; w: [in, out] bf16 (pre-transposed at init).
    """
    # bf16 MXU operands, f32 accumulation.
    y = jnp.dot(x.astype(jnp.bfloat16), w, preferred_element_type=jnp.float32)
    # Two independent cross-sublane reductions -> overlap in the XLU slot.
    inv_b = 1.0 / y.shape[0]
    s1 = jnp.sum(y, axis=0, keepdims=True)
    s2 = jnp.sum(y * y, axis=0, keepdims=True)
    mean = s1 * inv_b
    # Biased batch variance via E[y^2] - mean^2; clamp >= 0 against f32
    # cancellation, eps=1e-4 floors the rsqrt argument anyway.
    var = jnp.maximum(s2 * inv_b - mean * mean, 0.0)
    y_hat = (y - mean) * jax.lax.rsqrt(var + BN_EPS)     # rsqrt -> EUP slot
    # leaky_relu(y) == max(y, slope*y) for 0 < slope < 1: single vmax.
    return jnp.maximum(y_hat, LEAKY_SLOPE * y_hat)


def mlp_decoder_kernel(x_ref, w1_ref, w2_ref, wr_ref, o_ref):
    x = x_ref[...].astype(jnp.float32)                   # [B, rep_dim]
    h = _linear_bn_lrelu(x, w1_ref[...])                 # [B, h1]
    h = _linear_bn_lrelu(h, w2_ref[...])                 # [B, h2]
    r = jnp.dot(h.astype(jnp.bfloat16), wr_ref[...],
                preferred_element_type=jnp.float32)      # [B, xd_p]
    o_ref[...] = jax.nn.sigmoid(r).astype(o_ref.dtype)   # lane-dense store


def prepare_params(w1, w2, wr):
    """ONE-TIME weight prep (hoisted out of the per-call path).

    nn.Linear stores weights as [out, in]; transpose to [in, out] so the
    kernel does jnp.dot(x, w) with no in-kernel relayout, cast to bf16
    (halves the weight DMA, feeds the MXU directly), and zero-pad ONLY the
    reconstruction output dim to a 128-lane multiple (lane-dense final store;
    padded lanes are sliced off after the call).  Contraction dims keep their
    natural sizes (32 / 64 / 128) -- no K-dim padding.
    """
    x_dim = wr.shape[0]
    xd_p = _round_up(x_dim, LANE)
    w1_p = w1.T.astype(jnp.bfloat16)                      # [rep, h1]
    w2_p = w2.T.astype(jnp.bfloat16)                      # [h1, h2]
    wr_p = jnp.pad(wr.T.astype(jnp.bfloat16),             # [h2, xd_p]
                   ((0, 0), (0, xd_p - x_dim)))
    return w1_p, w2_p, wr_p


def mlp_decoder(x, w1_p, w2_p, wr_p, x_dim):
    """x: [B, ...] f32 latent code; w*_p: pre-prepared [in,out] bf16 weights.

    Returns [B, x_dim] f32 sigmoid reconstruction.
    """
    B = x.shape[0]
    x2 = x.reshape(B, -1).astype(jnp.float32)             # x.view(B, -1)
    rep = x2.shape[1]
    h1 = w1_p.shape[1]
    h2 = w2_p.shape[1]
    xd_p = wr_p.shape[1]

    cost = pl.CostEstimate(
        flops=2 * B * (rep * h1 + h1 * h2 + h2 * xd_p),
        transcendentals=B * xd_p + 2 * (h1 + h2),          # sigmoid + rsqrt
        bytes_accessed=(x2.size * 4
                        + (w1_p.size + w2_p.size + wr_p.size) * 2
                        + B * xd_p * 4),
    )

    out_p = pl.pallas_call(
        mlp_decoder_kernel,
        out_shape=jax.ShapeDtypeStruct((B, xd_p), jnp.float32),
        # No grid: whole arrays are staged into VMEM as single full-extent
        # blocks (total footprint ~55 KiB at these shapes).
        in_specs=[
            pl.BlockSpec(memory_space=pltpu.VMEM),
            pl.BlockSpec(memory_space=pltpu.VMEM),
            pl.BlockSpec(memory_space=pltpu.VMEM),
            pl.BlockSpec(memory_space=pltpu.VMEM),
        ],
        out_specs=pl.BlockSpec(memory_space=pltpu.VMEM),
        # Explicit VMEM budget: the single-tile whole-batch design needs
        # ~1.3 KB of live f32/bf16 activations per batch row; 32 MiB keeps us
        # safely inside v7x's 64 MiB/TC as well as v5e/v6e's 128 MiB.
        compiler_params=pltpu.CompilerParams(vmem_limit_bytes=32 * 1024 * 1024),
        cost_estimate=cost,
    )(x2, w1_p, w2_p, wr_p)

    return out_p[:, :x_dim]


def mlp_decoder_ref(x, w1, w2, wr):
    """Pure-JAX f32 reference (matches the PyTorch module in train mode)."""
    def layer(h, w):
        y = h @ w.T
        mean = jnp.mean(y, axis=0, keepdims=True)
        var = jnp.mean((y - mean) ** 2, axis=0, keepdims=True)
        y = (y - mean) / jnp.sqrt(var + BN_EPS)
        return jnp.where(y >= 0, y, LEAKY_SLOPE * y)

    h = layer(x.reshape(x.shape[0], -1), w1)
    h = layer(h, w2)
    return jax.nn.sigmoid(h @ wr.T)


def init_params(key, x_dim, h_dims, rep_dim):
    """Deterministic nn.Linear-style init: U(-1/sqrt(fan_in), 1/sqrt(fan_in))."""
    neurons = [rep_dim, *h_dims]
    keys = jax.random.split(key, len(neurons))
    ws = []
    for i in range(1, len(neurons)):
        fan_in, fan_out = neurons[i - 1], neurons[i]
        bound = 1.0 / (fan_in ** 0.5)
        ws.append(jax.random.uniform(keys[i - 1], (fan_out, fan_in),
                                     jnp.float32, -bound, bound))
    bound = 1.0 / (h_dims[-1] ** 0.5)
    wr = jax.random.uniform(keys[-1], (x_dim, h_dims[-1]),
                            jnp.float32, -bound, bound)
    return ws, wr


if __name__ == "__main__":
    key = jax.random.PRNGKey(0)
    k_x, k_p = jax.random.split(key)

    # Small shapes consistent with the module defaults.
    B, rep_dim, h_dims, x_dim = 8, 32, [64, 128], 64

    # Latent code input; forward does x.view(B, -1) so [B, rep_dim] works.
    x = jax.random.normal(k_x, (B, rep_dim), jnp.float32)

    (w1, w2), wr = init_params(k_p, x_dim, h_dims, rep_dim)

    # One-time weight prep (transpose / bf16 cast / lane-pad) -- not per call.
    w1_p, w2_p, wr_p = jax.block_until_ready(prepare_params(w1, w2, wr))

    decoder = jax.jit(functools.partial(mlp_decoder, x_dim=x_dim))
    out = decoder(x, w1_p, w2_p, wr_p)
    jax.block_until_ready(out)

    assert out.shape == (B, x_dim)
    assert bool(jnp.all(jnp.isfinite(out)))
    assert bool(jnp.all((out >= 0.0) & (out <= 1.0)))     # sigmoid output range

    # bf16 MXU operands -> not bit-exact vs. the f32 reference; BN rescaling
    # keeps the post-sigmoid error well below this tolerance.
    ref = mlp_decoder_ref(x, w1, w2, wr)
    max_err = float(jnp.max(jnp.abs(out - ref)))
    assert max_err < 0.08, f"max abs err vs f32 reference = {max_err}"

    print("KERNEL_OK")
</pallas_src>

<mosaic_0001>
module attributes {stable_mosaic.version = 11 : i64} {
  func.func @mlp_decoder_kernel(%arg0: memref<8x32xf32, #tpu.memory_space<vmem>>, %arg1: memref<32x64xbf16, #tpu.memory_space<vmem>>, %arg2: memref<64x128xbf16, #tpu.memory_space<vmem>>, %arg3: memref<128x128xbf16, #tpu.memory_space<vmem>>, %arg4: memref<8x128xf32, #tpu.memory_space<vmem>>) attributes {dimension_semantics = [], scalar_prefetch = 0 : i64, scratch_operands = 0 : i64, tpu.core_type = #tpu.core_type<tc>} {
    %c0 = arith.constant 0 : index
    %c0_0 = arith.constant 0 : index
    %0 = vector.load %arg0[%c0, %c0_0] : memref<8x32xf32, #tpu.memory_space<vmem>>, vector<8x32xf32>
    %c0_1 = arith.constant 0 : index
    %c0_2 = arith.constant 0 : index
    %1 = vector.load %arg1[%c0_1, %c0_2] : memref<32x64xbf16, #tpu.memory_space<vmem>>, vector<32x64xbf16>
    %2 = arith.truncf %0 : vector<8x32xf32> to vector<8x32xbf16>
    %cst = arith.constant dense<0.000000e+00> : vector<8x64xf32>
    %3 = tpu.matmul %2, %1, %cst {dimension_numbers = #tpu.dot_dimension_numbers<[1], [0], [0], [1], [0, 0, 1, 1], [], []>} : vector<8x32xbf16>, vector<32x64xbf16>, vector<8x64xf32> -> vector<8x64xf32>
    %cst_3 = arith.constant dense<0.000000e+00> : vector<64xf32>
    %4 = vector.multi_reduction <add>, %3, %cst_3 [0] : vector<8x64xf32> to vector<64xf32>
    %5 = vector.shape_cast %4 : vector<64xf32> to vector<1x64xf32>
    %6 = arith.mulf %3, %3 : vector<8x64xf32>
    %cst_4 = arith.constant dense<0.000000e+00> : vector<64xf32>
    %7 = vector.multi_reduction <add>, %6, %cst_4 [0] : vector<8x64xf32> to vector<64xf32>
    %8 = vector.shape_cast %7 : vector<64xf32> to vector<1x64xf32>
    %cst_5 = arith.constant 1.250000e-01 : f32
    %9 = vector.broadcast %cst_5 : f32 to vector<1x64xf32>
    %10 = arith.mulf %5, %9 : vector<1x64xf32>
    %cst_6 = arith.constant 1.250000e-01 : f32
    %11 = vector.broadcast %cst_6 : f32 to vector<1x64xf32>
    %12 = arith.mulf %8, %11 : vector<1x64xf32>
    %13 = arith.mulf %10, %10 : vector<1x64xf32>
    %14 = arith.subf %12, %13 : vector<1x64xf32>
    %cst_7 = arith.constant 0.000000e+00 : f32
    %15 = vector.broadcast %cst_7 : f32 to vector<1x64xf32>
    %16 = arith.maximumf %14, %15 : vector<1x64xf32>
    %17 = vector.broadcast %10 : vector<1x64xf32> to vector<8x64xf32>
    %18 = arith.subf %3, %17 : vector<8x64xf32>
    %cst_8 = arith.constant 9.99999974E-5 : f32
    %19 = vector.broadcast %cst_8 : f32 to vector<1x64xf32>
    %20 = arith.addf %16, %19 : vector<1x64xf32>
    %21 = math.rsqrt %20 : vector<1x64xf32>
    %22 = vector.broadcast %21 : vector<1x64xf32> to vector<8x64xf32>
    %23 = arith.mulf %18, %22 : vector<8x64xf32>
    %cst_9 = arith.constant 0.00999999977 : f32
    %24 = vector.broadcast %cst_9 : f32 to vector<8x64xf32>
    %25 = arith.mulf %24, %23 : vector<8x64xf32>
    %26 = arith.maximumf %23, %25 : vector<8x64xf32>
    %c0_10 = arith.constant 0 : index
    %c0_11 = arith.constant 0 : index
    %27 = vector.load %arg2[%c0_10, %c0_11] : memref<64x128xbf16, #tpu.memory_space<vmem>>, vector<64x128xbf16>
    %28 = arith.truncf %26 : vector<8x64xf32> to vector<8x64xbf16>
    %cst_12 = arith.constant dense<0.000000e+00> : vector<8x128xf32>
    %29 = tpu.matmul %28, %27, %cst_12 {dimension_numbers = #tpu.dot_dimension_numbers<[1], [0], [0], [1], [0, 0, 1, 1], [], []>} : vector<8x64xbf16>, vector<64x128xbf16>, vector<8x128xf32> -> vector<8x128xf32>
    %cst_13 = arith.constant dense<0.000000e+00> : vector<128xf32>
    %30 = vector.multi_reduction <add>, %29, %cst_13 [0] : vector<8x128xf32> to vector<128xf32>
    %31 = vector.shape_cast %30 : vector<128xf32> to vector<1x128xf32>
    %32 = arith.mulf %29, %29 : vector<8x128xf32>
    %cst_14 = arith.constant dense<0.000000e+00> : vector<128xf32>
    %33 = vector.multi_reduction <add>, %32, %cst_14 [0] : vector<8x128xf32> to vector<128xf32>
    %34 = vector.shape_cast %33 : vector<128xf32> to vector<1x128xf32>
    %cst_15 = arith.constant 1.250000e-01 : f32
    %35 = vector.broadcast %cst_15 : f32 to vector<1x128xf32>
    %36 = arith.mulf %31, %35 : vector<1x128xf32>
    %cst_16 = arith.constant 1.250000e-01 : f32
    %37 = vector.broadcast %cst_16 : f32 to vector<1x128xf32>
    %38 = arith.mulf %34, %37 : vector<1x128xf32>
    %39 = arith.mulf %36, %36 : vector<1x128xf32>
    %40 = arith.subf %38, %39 : vector<1x128xf32>
    %cst_17 = arith.constant 0.000000e+00 : f32
    %41 = vector.broadcast %cst_17 : f32 to vector<1x128xf32>
    %42 = arith.maximumf %40, %41 : vector<1x128xf32>
    %43 = vector.broadcast %36 : vector<1x128xf32> to vector<8x128xf32>
    %44 = arith.subf %29, %43 : vector<8x128xf32>
    %cst_18 = arith.constant 9.99999974E-5 : f32
    %45 = vector.broadcast %cst_18 : f32 to vector<1x128xf32>
    %46 = arith.addf %42, %45 : vector<1x128xf32>
    %47 = math.rsqrt %46 : vector<1x128xf32>
    %48 = vector.broadcast %47 : vector<1x128xf32> to vector<8x128xf32>
    %49 = arith.mulf %44, %48 : vector<8x128xf32>
    %cst_19 = arith.constant 0.00999999977 : f32
    %50 = vector.broadcast %cst_19 : f32 to vector<8x128xf32>
    %51 = arith.mulf %50, %49 : vector<8x128xf32>
    %52 = arith.maximumf %49, %51 : vector<8x128xf32>
    %53 = arith.truncf %52 : vector<8x128xf32> to vector<8x128xbf16>
    %c0_20 = arith.constant 0 : index
    %c0_21 = arith.constant 0 : index
    %54 = vector.load %arg3[%c0_20, %c0_21] : memref<128x128xbf16, #tpu.memory_space<vmem>>, vector<128x128xbf16>
    %cst_22 = arith.constant dense<0.000000e+00> : vector<8x128xf32>
    %55 = tpu.matmul %53, %54, %cst_22 {dimension_numbers = #tpu.dot_dimension_numbers<[1], [0], [0], [1], [0, 0, 1, 1], [], []>} : vector<8x128xbf16>, vector<128x128xbf16>, vector<8x128xf32> -> vector<8x128xf32>
    %56 = arith.negf %55 : vector<8x128xf32>
    %57 = math.exp %56 : vector<8x128xf32>
    %cst_23 = arith.constant 1.000000e+00 : f32
    %58 = vector.broadcast %cst_23 : f32 to vector<8x128xf32>
    %59 = arith.addf %58, %57 : vector<8x128xf32>
    %60 = arith.divf %58, %59 : vector<8x128xf32>
    %c0_24 = arith.constant 0 : index
    %c0_25 = arith.constant 0 : index
    %61 = vector.load %arg4[%c0_24, %c0_25] : memref<8x128xf32, #tpu.memory_space<vmem>>, vector<8x128xf32>
    tpu.vector_store %arg4[%c0_24, %c0_25], %60 {strides = array<i32>} : memref<8x128xf32, #tpu.memory_space<vmem>>, vector<8x128xf32>,
    return
  }
}

</mosaic_0001>

<bundles_post_ra>
// kernel: mlp_decoder.1
= control target key start
LH: loop header
LB: loop body
LE: loop exit
PB: predicated region body
PF: predicated region fallthrough
CT: control target
= control target key end

     0   :  { %9 = vsyncpa [#allocation3], 0  ;;  %s616_s0 = inlined_call_operand.hbm [shape: f32[8,32], index: 0, kind: input, shape index: {}]   ;;  %s617_s1 = inlined_call_operand.hbm [shape: bf16[32,64], index: 1, kind: input, shape index: {}]   ;;  %s618_s2 = inlined_call_operand.hbm [shape: bf16[64,128], index: 2, kind: input, shape index: {}]   ;;  %s619_s3 = inlined_call_operand.hbm [shape: bf16[128,128], index: 3, kind: input, shape index: {}]   ;;  %s620_s4 = inlined_call_operand.hbm [shape: f32[8,128], index: 4, kind: output, shape index: {}]  }
   0x1   :  { %10 = vsyncpa [#allocation6], 0 }
   0x2   :  { %11 = vsyncpa [#allocation9], 0  ;;  %s28_s17 = sshll.u32 %s617_s1, 4  ;;  %s29_s17 = int_to_ptr.hbm [resolvable:$true] %s28_s17 }
   0x3   :  { %12 = vsyncpa [#allocation4], 0  ;;  %s566_s18 = smov [#allocation5]   ;;  %s18_s22 = sshll.u32 %s616_s0, 4  ;;  %s19_s22 = int_to_ptr.hbm [resolvable:$true] %s18_s22 }
   0x4   :  { %s30_s19 = sshll.u32 %s566_s18, 4  ;;  %s567_s23 = smov 64   ;;  %s31_s19 = int_to_ptr.vmem [resolvable:$true] %s30_s19 }
   0x5   :  { %s568_s24 = smov 4   ;;  %s569_s25 = smov [#allocation2]  }
   0x6   :  { %36 = dma.hbm_to_vmem [thread:$0]  %s29_s17, 256, %s31_s19, [#allocation6], %s567_s23, %s567_s23, %s568_s24  }
   0x7   :  { %s20_s26 = sshll.u32 %s569_s25, 4  ;;  %s41_s29 = sshll.u32 %s618_s2, 4  ;;  %s21_s26 = int_to_ptr.vmem [resolvable:$true] %s20_s26  ;;  %s42_s29 = int_to_ptr.hbm [resolvable:$true] %s41_s29 }
   0x8   :  { %23 = dma.hbm_to_vmem [thread:$0]  %s19_s22, 128, %s21_s26, [#allocation3]  }
   0x9   :  { %s54_s5 = sshll.u32 %s619_s3, 4  ;;  %s570_s6 = smov [#allocation7]   ;;  %s55_s5 = int_to_ptr.hbm [resolvable:$true] %s54_s5 }
   0xa   :  { %s43_s7 = sshll.u32 %s570_s6, 4  ;;  %s571_s0 = smov [#allocation8]   ;;  %s44_s7 = int_to_ptr.vmem [resolvable:$true] %s43_s7 }
   0xb   :  { %49 = dma.hbm_to_vmem [thread:$0]  %s42_s29, 512, %s44_s7, [#allocation6], %s567_s23, %s567_s23, %s568_s24  }
   0xc   :  { %s56_s8 = sshll.u32 %s571_s0, 4  ;;  %s57_s8 = int_to_ptr.vmem [resolvable:$true] %s56_s8 }
   0xd   :  { %62 = dma.hbm_to_vmem [thread:$0]  %s55_s5, 1024, %s57_s8, [#allocation9], %s567_s23, %s567_s23, %s568_s24  }
   0xe   :  { %558 = dma.done.wait [#allocation3], 128  }
   0xf   :  { %559 = vsyncadd [#allocation3], 4294967168 }
  0x10   :  { %560 = dma.done.wait [#allocation6], 768  }
  0x11   :  { %561 = vsyncadd [#allocation6], 4294966528 }
  0x12   :  { %562 = dma.done.wait [#allocation9], 1024  }
  0x13   :  { %563 = vsyncadd [#allocation9], 4294966272  ;;  %v410_v0 = vld [vmem:[#allocation5 + $0x8] sm:$0xff]  ;;  %v409_v1 = vld [vmem:[#allocation5] sm:$0xff]  ;;  %vm98_vm0 = vcmask 261120   ;;  %vm115_vm1 = vcmask 523264  }
  0x14   :  { %108 = vmatpush.bf16.msra.mxu0 %v410_v0  ;;  %v80_v2 = vld [vmem:[#allocation2] sm:$0xff]  ;;  %v414_v4 = vld [vmem:[#allocation7 + $0x18] sm:$0xff]  ;;  %v413_v5 = vld [vmem:[#allocation7 + $0x10] sm:$0xff]  ;;  %s572_s2 = smov [#allocation10]   ;;  %s338_s11 = sshll.u32 %s620_s4, 4  ;;  %s339_s11 = int_to_ptr.hbm [resolvable:$true] %s338_s11 }
  0x15   :  { %v85_v3 = vpack.c.bf16 %v80_v2, %v80_v2  ;;  %191 = vmatpush.bf16.msra.mxu1 %v414_v4  ;;  %v412_v6 = vld [vmem:[#allocation7 + $0x8] sm:$0xff]  ;;  %v411_v7 = vld [vmem:[#allocation7] sm:$0xff]  ;;  %v422_v43 = vld [vmem:[#allocation8 + $0x38] sm:$0xff]  ;;  %s336_s3 = sshll.u32 %s572_s2, 4  ;;  %s337_s3 = int_to_ptr.vmem [resolvable:$true] %s336_s3 }
  0x16   :  { %298 = vmatpush.bf16.msra.mxu2 %v422_v43  ;;  %v421_v44 = vld [vmem:[#allocation8 + $0x30] sm:$0xff]  ;;  %v420_v45 = vld [vmem:[#allocation8 + $0x28] sm:$0xff]  ;;  %v419_v46 = vld [vmem:[#allocation8 + $0x20] sm:$0xff] }
  0x17   :  { %v418_v47 = vld [vmem:[#allocation8 + $0x18] sm:$0xff]  ;;  %v417_v51 = vld [vmem:[#allocation8 + $0x10] sm:$0xff]  ;;  %v416_v56 = vld [vmem:[#allocation8 + $0x8] sm:$0xff] }
  0x18   :  { %109 = vmatpush.bf16.msra.mxu0 %v409_v1  ;;  %v415_v62 = vld [vmem:[#allocation8] sm:$0xff] }
  0x19   :  { %192 = vmatpush.bf16.msra.mxu1 %v413_v5 }
  0x1a   :  { %299 = vmatpush.bf16.msra.mxu2 %v421_v44 }
  0x1b   :  { %358 = vmatmul.msk.bf16.vlgmr.msra.gmra.mxu0 %vm98_vm0, %v85_v3 }
  0x1d   :  { %193 = vmatpush.bf16.msra.mxu1 %v412_v6 }
  0x1e   :  { %300 = vmatpush.bf16.msra.mxu2 %v420_v45 }
  0x21   :  { %194 = vmatpush.bf16.msra.mxu1 %v411_v7 }
  0x22   :  { %301 = vmatpush.bf16.msra.mxu2 %v419_v46 }
  0x26   :  { %302 = vmatpush.bf16.msra.mxu2 %v418_v47 }
  0x2a   :  { %303 = vmatpush.bf16.msra.mxu2 %v417_v51 }
  0x2e   :  { %304 = vmatpush.bf16.msra.mxu2 %v416_v56 }
  0x32   :  { %305 = vmatpush.bf16.msra.mxu2 %v415_v62 }
  0x98   :  { %v111_v8 = vpop.f32.mrf.mxu0 }
  0x99   :  { %v123_v9 = vmul.f32 %v111_v8, %v111_v8  ;;  %v116_v10 = vsel %vm115_vm1, %v111_v8, 0.0 }
  0x9a   :  { %v117_v11 = vrot.slane %v116_v10, 4 }
  0x9b   :  { %v124_v12 = vsel %vm115_vm1, %v123_v9, 0.0 }
  0x9c   :  { %v118_v13 = vadd.f32 %v117_v11, %v116_v10  ;;  %v125_v14 = vrot.slane %v124_v12, 4 }
  0x9e   :  { %v119_v15 = vrot.slane %v118_v13, 2  ;;  %v126_v16 = vadd.f32 %v125_v14, %v124_v12 }
  0xa0   :  { %v113_v17 = vpop.f32.mrf.mxu0  ;;  %v120_v18 = vadd.f32 %v119_v15, %v118_v13  ;;  %v127_v19 = vrot.slane %v126_v16, 2 }
  0xa2   :  { %v121_v20 = vrot.slane %v120_v18, 1  ;;  %v128_v21 = vadd.f32 %v127_v19, %v126_v16 }
  0xa4   :  { %v122_v22 = vadd.f32 %v121_v20, %v120_v18  ;;  %v129_v23 = vrot.slane %v128_v21, 1 }
  0xa6   :  { %v130_v24 = vadd.f32 %v129_v23, %v128_v21  ;;  %v131_v25 = vmul.f32 0.125, %v122_v22 }
  0xa8   :  { %v132_v26 = vmul.f32 0.125, %v130_v24  ;;  %v133_v27 = vmul.f32 %v131_v25, %v131_v25  ;;  %v136_v37 = vsub.f32 %v111_v8, %v131_v25 }
  0xaa   :  { %v134_v28 = vsub.f32 %v132_v26, %v133_v27 }
  0xac   :  { %v135_v29 = vmax.f32 %v134_v28, 0.0 }
  0xae   :  { %v137_v30 = vadd.f32 0.0001, %v135_v29 }
  0xb0   :  { %430 = vrsqrt.f32 %v137_v30  ;;  %vm144_vm3 = vweird.f32 %v137_v30 }
  0xb6   :  { %v431_v31 = vpop.eup %430 }
  0xb7   :  { %v139_v32 = vmul.f32 %v431_v31, %v137_v30  ;;  %vm145_vm2 = vweird.f32 %v431_v31 }
  0xb8   :  { %vm146_vm4 = vmor %vm144_vm3, %vm145_vm2 }
  0xb9   :  { %v140_v33 = vmul.f32 %v431_v31, %v139_v32 }
  0xbb   :  { %v141_v34 = vmul.f32 0.5, %v140_v33 }
  0xbd   :  { %v142_v35 = vsub.f32 1.5, %v141_v34 }
  0xbf   :  { %v143_v36 = vmul.f32 %v431_v31, %v142_v35 }
  0xc1   :  { %v147_v38 = vsel %vm146_vm4, %v431_v31, %v143_v36 }
  0xc2   :  { %v148_v39 = vmul.f32 %v147_v38, %v136_v37 }
  0xc4   :  { %v149_v40 = vmul.f32 0.01, %v148_v39 }
  0xc6   :  { %v150_v41 = vmax.f32 %v148_v39, %v149_v40 }
  0xc8   :  { %v159_v42 = vpack.c.bf16 %v150_v41, %v150_v41 }
  0xca   :  { %375 = vmatmul.msk.bf16.vlgmr.msra.gmra.mxu1 %vm115_vm1, %v159_v42 }
 0x147   :  { %v196_v48 = vpop.f32.mrf.mxu1 }
 0x148   :  { %v200_v49 = vrot.slane %v196_v48, 4  ;;  %v206_v50 = vmul.f32 %v196_v48, %v196_v48 }
 0x14a   :  { %v201_v52 = vadd.f32 %v200_v49, %v196_v48  ;;  %v207_v53 = vrot.slane %v206_v50, 4 }
 0x14c   :  { %v202_v54 = vrot.slane %v201_v52, 2  ;;  %v208_v55 = vadd.f32 %v207_v53, %v206_v50 }
 0x14e   :  { %v203_v57 = vadd.f32 %v202_v54, %v201_v52  ;;  %v209_v58 = vrot.slane %v208_v55, 2 }
 0x14f   :  { %v198_v59 = vpop.f32.mrf.mxu1 }
 0x150   :  { %v204_v60 = vrot.slane %v203_v57, 1  ;;  %v210_v61 = vadd.f32 %v209_v58, %v208_v55 }
 0x152   :  { %v205_v63 = vadd.f32 %v204_v60, %v203_v57  ;;  %v211_v0 = vrot.slane %v210_v61, 1 }
 0x154   :  { %v212_v1 = vadd.f32 %v211_v0, %v210_v61  ;;  %v213_v2 = vmul.f32 0.125, %v205_v63 }
 0x156   :  { %v214_v3 = vmul.f32 0.125, %v212_v1  ;;  %v215_v4 = vmul.f32 %v213_v2, %v213_v2  ;;  %v218_v14 = vsub.f32 %v196_v48, %v213_v2 }
 0x158   :  { %v216_v5 = vsub.f32 %v214_v3, %v215_v4 }
 0x15a   :  { %v217_v6 = vmax.f32 %v216_v5, 0.0 }
 0x15c   :  { %v219_v7 = vadd.f32 0.0001, %v217_v6 }
 0x15e   :  { %432 = vrsqrt.f32 %v219_v7  ;;  %vm226_vm6 = vweird.f32 %v219_v7 }
 0x164   :  { %v433_v8 = vpop.eup %432 }
 0x165   :  { %v221_v9 = vmul.f32 %v433_v8, %v219_v7  ;;  %vm227_vm5 = vweird.f32 %v433_v8 }
 0x166   :  { %vm228_vm7 = vmor %vm226_vm6, %vm227_vm5 }
 0x167   :  { %v222_v10 = vmul.f32 %v433_v8, %v221_v9 }
 0x169   :  { %v223_v11 = vmul.f32 0.5, %v222_v10 }
 0x16b   :  { %v224_v12 = vsub.f32 1.5, %v223_v11 }
 0x16d   :  { %v225_v13 = vmul.f32 %v433_v8, %v224_v12 }
 0x16f   :  { %v229_v15 = vsel %vm228_vm7, %v433_v8, %v225_v13 }
 0x170   :  { %v230_v16 = vmul.f32 %v229_v15, %v218_v14 }
 0x172   :  { %v231_v17 = vmul.f32 0.01, %v230_v16 }
 0x174   :  { %v232_v18 = vmax.f32 %v230_v16, %v231_v17 }
 0x176   :  { %v233_v19 = vpack.c.bf16 %v232_v18, %v232_v18 }
 0x178   :  { %306 = vmatmul.bf16.vlgmr.msra.gmra.mxu2 %v233_v19 }
 0x1fb   :  { %v307_v20 = vpop.f32.mrf.mxu2 }
 0x1fc   :  { %v408_v21 = vmul.f32 -1.442695, %v307_v20 }
 0x1fe   :  { %434 = vpow2.f32 %v408_v21 }
 0x203   :  { %v309_v22 = vpop.f32.mrf.mxu2 }
 0x204   :  { %v435_v23 = vpop.eup %434 }
 0x205   :  { %v314_v24 = vadd.f32 1.0, %v435_v23 }
 0x207   :  { %436 = vrcp.f32 %v314_v24  ;;  %v326_v28 = vand.u32 2147483648, %v314_v24  ;;  %v324_v30 = vand.u32 2147483647, %v314_v24  ;;  %vm320_vm9 = vweird.f32 %v314_v24 }
 0x209   :  { %v327_v32 = vor.u32 1.1754944e-38, %v326_v28  ;;  %vm325_vm11 = vcmp.eq.f32.partialorder %v324_v30, 8.507059e+37 }
 0x20d   :  { %v437_v25 = vpop.eup %436 }
 0x20e   :  { %v316_v26 = vmul.f32 %v437_v25, %v314_v24  ;;  %vm321_vm8 = vweird.f32 %v437_v25 }
 0x20f   :  { %vm322_vm10 = vmor %vm320_vm9, %vm321_vm8 }
 0x210   :  { %v317_v27 = vsub.f32 1.0, %v316_v26 }
 0x212   :  { %v318_v29 = vmul.f32 %v437_v25, %v317_v27 }
 0x214   :  { %v319_v31 = vadd.f32 %v437_v25, %v318_v29 }
 0x216   :  { %v323_v33 = vsel %vm322_vm10, %v437_v25, %v319_v31 }
 0x217   :  { %v328_v34 = vsel %vm325_vm11, %v327_v32, %v323_v33 }
 0x218   :  { %330 = vst [vmem:[#allocation10] sm:$0xff] %v328_v34 }
 0x219   :  { %341 = dma.vmem_to_hbm [thread:$0]  %s337_s3, 128, %s339_s11, [#allocation4]  }
 0x21a   :  { %564 = dma.done.wait [#allocation4], 128  }
 0x21b   :  { %565 = vsyncadd [#allocation4], 4294967168 }
 0x21c   :  { %346 = vsyncpa [#allocation3], 1 }
 0x21d   :  { %347 = vsyncpa [#allocation6], 1 }
 0x21e   :  { %348 = vsyncpa [#allocation9], 1 }
 0x21f   :  { %349 = vsyncpa [#allocation4], 1 }

</bundles_post_ra>
